<compile_context>
chip_gen: v7x
topology: tpu7x:2x2x1
jax: 0.10.0
libtpu: 0.0.40
codegen_flags: <defaults>
</compile_context>

<pallas_src>
import jax
import jax.numpy as jnp
from jax import lax
from jax.experimental import pallas as pl
from jax.experimental.pallas import tpu as pltpu


def mt_rnn_kernel(
    x_ref,       # (T, B, X)        whole input sequence (batch padded to sublane multiple)
    wx_ref,      # (X, DFX)         feature_extractor_x linear (transposed)
    bx_ref,      # (1, DFX)
    wih_ref,     # (DFX, H)         RNN input->hidden (transposed)
    bih_ref,     # (1, H)
    whcat_ref,   # (H, HP+DHX)      [Whh | 0 | Whx]  with Whx placed at lane-aligned col HP
    bhcat_ref,   # (1, HP+DHX)      [bhh | 0 | bhx]
    wout_ref,    # (DHX, Y)         gen_out linear (transposed)
    bout_ref,    # (1, Y)
    alpha_ref,   # (1, H)           alphas_per_unit
    y_ref,       # (T, B, Y)        output
    zih_scr,     # VMEM (T, B, H)   hoisted  feat_t @ Wih + bih  for all t
    dec_scr,     # VMEM (T, B, DHX) per-step dec_t = tanh(h_t @ Whx + bhx)
):
    seq_len, B, X = x_ref.shape
    H = alpha_ref.shape[1]
    DHX = dec_scr.shape[2]
    Y = y_ref.shape[2]
    HP = whcat_ref.shape[1] - DHX          # lane-aligned offset of the Whx block

    # ---- hoisted, non-recurrent work: feature extractor + input->hidden projection ----
    x_all = x_ref[...].reshape(seq_len * B, X)
    feat = jnp.tanh(
        jnp.dot(x_all, wx_ref[...], preferred_element_type=jnp.float32) + bx_ref[...]
    )
    zih = jnp.dot(feat, wih_ref[...], preferred_element_type=jnp.float32) + bih_ref[...]
    zih_scr[...] = zih.reshape(seq_len, B, H)

    # ---- loop invariants hoisted once (kept in vregs across iterations) ----
    alpha = alpha_ref[...]                 # (1, H), broadcasts over B
    one_m_alpha = 1.0 - alpha
    w_hcat = whcat_ref[...]
    b_hcat = bhcat_ref[...]

    def body(t, h):
        # Single fused MXU pass over everything that depends on h_t.
        z = jnp.dot(h, w_hcat, preferred_element_type=jnp.float32) + b_hcat   # (B, HP+DHX)
        # generation_x uses h BEFORE the recurrence update.
        dec_scr[t] = jnp.tanh(z[:, HP:HP + DHX])                              # tile-aligned slice
        # nn.RNN (tanh) cell + leaky integration with alphas_per_unit.
        h_new = jnp.tanh(z[:, :H] + zih_scr[t])
        return one_m_alpha * h + alpha * h_new

    h0 = jnp.zeros((B, H), jnp.float32)
    lax.fori_loop(0, seq_len, body, h0, unroll=seq_len <= 16)

    # ---- deferred output projection: one big matmul + one lane-dense bulk store ----
    dec_all = dec_scr[...].reshape(seq_len * B, DHX)
    y_all = jnp.dot(dec_all, wout_ref[...], preferred_element_type=jnp.float32) + bout_ref[...]
    y_ref[...] = y_all.reshape(seq_len, B, Y).astype(y_ref.dtype)


def mt_rnn_forward(x, params, alpha_vec):
    """x: (seq_len, batch, x_dim) float32.  Returns y: (seq_len, batch, y_dim)."""
    seq_len, B, X = x.shape
    Wx, bx, Wih, bih, Whh, bhh, Whx, bhx, Wout, bout = params
    DFX = Wx.shape[1]
    H = Wih.shape[1]
    DHX = Whx.shape[1]
    Y = Wout.shape[1]

    # Pad batch to a multiple of 8 (sublane height); padded rows are independent garbage
    # and are sliced away afterwards.
    Bp = max(8, ((B + 7) // 8) * 8)
    x_pad = x if Bp == B else jnp.pad(x, ((0, 0), (0, Bp - B), (0, 0)))

    # Fuse the h-consuming weights into one matmul operand.  Place the Whx block at a
    # 128-lane-aligned column offset HP so the in-kernel output slices are tile-aligned.
    HP = ((H + 127) // 128) * 128
    W_hcat = jnp.zeros((H, HP + DHX), jnp.float32)
    W_hcat = W_hcat.at[:, :H].set(Whh).at[:, HP:HP + DHX].set(Whx)
    b_hcat = jnp.zeros((1, HP + DHX), jnp.float32)
    b_hcat = b_hcat.at[:, :H].set(bhh.reshape(1, H)).at[:, HP:HP + DHX].set(bhx.reshape(1, DHX))

    alpha2d = alpha_vec.reshape(1, H).astype(jnp.float32)

    n_inputs = 10
    vmem_specs = [pl.BlockSpec(memory_space=pltpu.MemorySpace.VMEM) for _ in range(n_inputs)]

    y_full = pl.pallas_call(
        mt_rnn_kernel,
        out_shape=jax.ShapeDtypeStruct((seq_len, Bp, Y), jnp.float32),
        in_specs=vmem_specs,
        out_specs=pl.BlockSpec(memory_space=pltpu.MemorySpace.VMEM),
        scratch_shapes=[
            pltpu.VMEM((seq_len, Bp, H), jnp.float32),    # zih for all timesteps
            pltpu.VMEM((seq_len, Bp, DHX), jnp.float32),  # dec for all timesteps
        ],
    )(x_pad, Wx, bx, Wih, bih, W_hcat, b_hcat, Wout, bout, alpha2d)

    return y_full[:, :B, :]


def mt_rnn_reference(x, params, alpha_vec):
    """Pure-JAX reference mirroring the PyTorch forward (mix_ratio=0, initialize_states)."""
    Wx, bx, Wih, bih, Whh, bhh, Whx, bhx, Wout, bout = params
    seq_len, B, _ = x.shape
    H = Wih.shape[1]
    feat_all = jnp.tanh(x @ Wx + bx)          # feature_extractor_x on whole sequence
    h_t = jnp.zeros((B, H), jnp.float32)
    ys = []
    for t in range(seq_len):
        dec = jnp.tanh(h_t @ Whx + bhx)
        y_t = dec @ Wout + bout
        ys.append(y_t)
        h_new = jnp.tanh(feat_all[t] @ Wih + bih + h_t @ Whh + bhh)
        h_t = (1.0 - alpha_vec) * h_t + alpha_vec * h_new
    return jnp.stack(ys, axis=0)


def make_alphas_per_unit(alphas, dim_rnn):
    # sigmas = inverse_sigmoid(alphas); alphas_per_unit = sigmoid(sigmas) tiled to dim_rnn
    a = jnp.asarray(alphas, jnp.float32)
    n = a.shape[0]
    if dim_rnn > n:
        reps, rem = dim_rnn // n, dim_rnn % n
        return jnp.concatenate([jnp.tile(a, reps), a[:rem]])
    return a[:dim_rnn]


if __name__ == "__main__":
    # Module hyperparameters (small, consistent with the forward pass):
    #   alphas=[0.1,0.5,0.9], x_dim=16, activation='tanh', dense_x=[32],
    #   dense_h_x=[32], dim_rnn=32, num_rnn=1, type_rnn='RNN', dropout_p=0
    seq_len, batch, x_dim = 8, 4, 16
    dfx, dim_rnn, dhx = 32, 32, 32
    y_dim = x_dim
    alphas = [0.1, 0.5, 0.9]

    key = jax.random.PRNGKey(0)
    keys = jax.random.split(key, 11)
    s = 0.1
    # Weights stored as (in, out) — i.e. PyTorch Linear weights pre-transposed.
    Wx   = s * jax.random.normal(keys[0], (x_dim, dfx), jnp.float32)
    bx   = s * jax.random.normal(keys[1], (1, dfx), jnp.float32)
    Wih  = s * jax.random.normal(keys[2], (dfx, dim_rnn), jnp.float32)
    bih  = s * jax.random.normal(keys[3], (1, dim_rnn), jnp.float32)
    Whh  = s * jax.random.normal(keys[4], (dim_rnn, dim_rnn), jnp.float32)
    bhh  = s * jax.random.normal(keys[5], (1, dim_rnn), jnp.float32)
    Whx  = s * jax.random.normal(keys[6], (dim_rnn, dhx), jnp.float32)
    bhx  = s * jax.random.normal(keys[7], (1, dhx), jnp.float32)
    Wout = s * jax.random.normal(keys[8], (dhx, y_dim), jnp.float32)
    bout = s * jax.random.normal(keys[9], (1, y_dim), jnp.float32)
    params = (Wx, bx, Wih, bih, Whh, bhh, Whx, bhx, Wout, bout)

    alpha_vec = make_alphas_per_unit(alphas, dim_rnn)

    x = jax.random.normal(keys[10], (seq_len, batch, x_dim), jnp.float32)

    y = mt_rnn_forward(x, params, alpha_vec)
    y = jax.block_until_ready(y)

    y_ref = mt_rnn_reference(x, params, alpha_vec)
    assert y.shape == (seq_len, batch, y_dim)
    assert jnp.allclose(y, y_ref, atol=1e-5, rtol=1e-5), "mismatch vs reference"

    # TODO(synk): LSTM variant (type_rnn='LSTM') and mode_selector autoregressive mixing
    # (mix_ratio > 0) are not exercised here; the default RNN teacher-forced path is.
    print("KERNEL_OK")
</pallas_src>

<mosaic_0001>
module attributes {stable_mosaic.version = 11 : i64} {
  func.func @mt_rnn_kernel(%arg0: memref<8x8x16xf32, #tpu.memory_space<vmem>>, %arg1: memref<16x32xf32, #tpu.memory_space<vmem>>, %arg2: memref<1x32xf32, #tpu.memory_space<vmem>>, %arg3: memref<32x32xf32, #tpu.memory_space<vmem>>, %arg4: memref<1x32xf32, #tpu.memory_space<vmem>>, %arg5: memref<32x160xf32, #tpu.memory_space<vmem>>, %arg6: memref<1x160xf32, #tpu.memory_space<vmem>>, %arg7: memref<32x16xf32, #tpu.memory_space<vmem>>, %arg8: memref<1x16xf32, #tpu.memory_space<vmem>>, %arg9: memref<1x32xf32, #tpu.memory_space<vmem>>, %arg10: memref<8x8x16xf32, #tpu.memory_space<vmem>>, %arg11: memref<8x8x32xf32, #tpu.memory_space<vmem>>, %arg12: memref<8x8x32xf32, #tpu.memory_space<vmem>>) attributes {dimension_semantics = [], scalar_prefetch = 0 : i64, scratch_operands = 2 : i64, tpu.core_type = #tpu.core_type<tc>} {
    %c0 = arith.constant 0 : index
    %c0_0 = arith.constant 0 : index
    %c0_1 = arith.constant 0 : index
    %0 = vector.load %arg0[%c0, %c0_0, %c0_1] : memref<8x8x16xf32, #tpu.memory_space<vmem>>, vector<8x8x16xf32>
    %1 = vector.shape_cast %0 : vector<8x8x16xf32> to vector<64x16xf32>
    %c0_2 = arith.constant 0 : index
    %c0_3 = arith.constant 0 : index
    %2 = vector.load %arg1[%c0_2, %c0_3] : memref<16x32xf32, #tpu.memory_space<vmem>>, vector<16x32xf32>
    %cst = arith.constant dense<0.000000e+00> : vector<64x32xf32>
    %3 = tpu.matmul %1, %2, %cst {dimension_numbers = #tpu.dot_dimension_numbers<[1], [0], [0], [1], [0, 0, 1, 1], [], []>} : vector<64x16xf32>, vector<16x32xf32>, vector<64x32xf32> -> vector<64x32xf32>
    %c0_4 = arith.constant 0 : index
    %c0_5 = arith.constant 0 : index
    %4 = vector.load %arg2[%c0_4, %c0_5] : memref<1x32xf32, #tpu.memory_space<vmem>>, vector<1x32xf32>
    %5 = vector.broadcast %4 : vector<1x32xf32> to vector<64x32xf32>
    %6 = arith.addf %3, %5 : vector<64x32xf32>
    %7 = math.tanh %6 : vector<64x32xf32>
    %c0_6 = arith.constant 0 : index
    %c0_7 = arith.constant 0 : index
    %8 = vector.load %arg3[%c0_6, %c0_7] : memref<32x32xf32, #tpu.memory_space<vmem>>, vector<32x32xf32>
    %cst_8 = arith.constant dense<0.000000e+00> : vector<64x32xf32>
    %9 = tpu.matmul %7, %8, %cst_8 {dimension_numbers = #tpu.dot_dimension_numbers<[1], [0], [0], [1], [0, 0, 1, 1], [], []>} : vector<64x32xf32>, vector<32x32xf32>, vector<64x32xf32> -> vector<64x32xf32>
    %c0_9 = arith.constant 0 : index
    %c0_10 = arith.constant 0 : index
    %10 = vector.load %arg4[%c0_9, %c0_10] : memref<1x32xf32, #tpu.memory_space<vmem>>, vector<1x32xf32>
    %11 = vector.broadcast %10 : vector<1x32xf32> to vector<64x32xf32>
    %12 = arith.addf %9, %11 : vector<64x32xf32>
    %13 = vector.shape_cast %12 : vector<64x32xf32> to vector<8x8x32xf32>
    %c0_11 = arith.constant 0 : index
    %c0_12 = arith.constant 0 : index
    %c0_13 = arith.constant 0 : index
    %14 = vector.load %arg11[%c0_11, %c0_12, %c0_13] : memref<8x8x32xf32, #tpu.memory_space<vmem>>, vector<8x8x32xf32>
    tpu.vector_store %arg11[%c0_11, %c0_12, %c0_13], %13 {strides = array<i32>} : memref<8x8x32xf32, #tpu.memory_space<vmem>>, vector<8x8x32xf32>,
    %c0_14 = arith.constant 0 : index
    %c0_15 = arith.constant 0 : index
    %15 = vector.load %arg9[%c0_14, %c0_15] : memref<1x32xf32, #tpu.memory_space<vmem>>, vector<1x32xf32>
    %cst_16 = arith.constant 1.000000e+00 : f32
    %16 = vector.broadcast %cst_16 : f32 to vector<1x32xf32>
    %17 = arith.subf %16, %15 : vector<1x32xf32>
    %c0_17 = arith.constant 0 : index
    %c0_18 = arith.constant 0 : index
    %18 = vector.load %arg5[%c0_17, %c0_18] : memref<32x160xf32, #tpu.memory_space<vmem>>, vector<32x160xf32>
    %c0_19 = arith.constant 0 : index
    %c0_20 = arith.constant 0 : index
    %19 = vector.load %arg6[%c0_19, %c0_20] : memref<1x160xf32, #tpu.memory_space<vmem>>, vector<1x160xf32>
    %cst_21 = arith.constant 0.000000e+00 : f32
    %20 = vector.broadcast %cst_21 : f32 to vector<8x32xf32>
    %c0_i32 = arith.constant 0 : i32
    %cst_22 = arith.constant dense<0.000000e+00> : vector<8x160xf32>
    %21 = tpu.matmul %20, %18, %cst_22 {dimension_numbers = #tpu.dot_dimension_numbers<[1], [0], [0], [1], [0, 0, 1, 1], [], []>} : vector<8x32xf32>, vector<32x160xf32>, vector<8x160xf32> -> vector<8x160xf32>
    %22 = vector.broadcast %19 : vector<1x160xf32> to vector<8x160xf32>
    %23 = arith.addf %21, %22 : vector<8x160xf32>
    %24 = vector.extract_strided_slice %23 {offsets = [0, 128], sizes = [8, 32], strides = [1, 1]} : vector<8x160xf32> to vector<8x32xf32>
    %25 = math.tanh %24 : vector<8x32xf32>
    %26 = arith.index_cast %c0_i32 : i32 to index
    %c0_23 = arith.constant 0 : index
    %c0_24 = arith.constant 0 : index
    %27 = vector.load %arg12[%26, %c0_23, %c0_24] : memref<8x8x32xf32, #tpu.memory_space<vmem>>, vector<1x8x32xf32>
    %28 = vector.shape_cast %27 : vector<1x8x32xf32> to vector<8x32xf32>
    %29 = vector.shape_cast %25 : vector<8x32xf32> to vector<1x8x32xf32>
    tpu.vector_store %arg12[%26, %c0_23, %c0_24], %29 {strides = array<i32>} : memref<8x8x32xf32, #tpu.memory_space<vmem>>, vector<1x8x32xf32>,
    %30 = vector.extract_strided_slice %23 {offsets = [0, 0], sizes = [8, 32], strides = [1, 1]} : vector<8x160xf32> to vector<8x32xf32>
    %31 = arith.index_cast %c0_i32 : i32 to index
    %c0_25 = arith.constant 0 : index
    %c0_26 = arith.constant 0 : index
    %32 = vector.load %arg11[%31, %c0_25, %c0_26] : memref<8x8x32xf32, #tpu.memory_space<vmem>>, vector<1x8x32xf32>
    %33 = vector.shape_cast %32 : vector<1x8x32xf32> to vector<8x32xf32>
    %34 = arith.addf %30, %33 : vector<8x32xf32>
    %35 = math.tanh %34 : vector<8x32xf32>
    %36 = vector.broadcast %17 : vector<1x32xf32> to vector<8x32xf32>
    %37 = arith.mulf %36, %20 : vector<8x32xf32>
    %38 = vector.broadcast %15 : vector<1x32xf32> to vector<8x32xf32>
    %39 = arith.mulf %38, %35 : vector<8x32xf32>
    %40 = arith.addf %37, %39 : vector<8x32xf32>
    %c1_i32 = arith.constant 1 : i32
    %cst_27 = arith.constant dense<0.000000e+00> : vector<8x160xf32>
    %41 = tpu.matmul %40, %18, %cst_27 {dimension_numbers = #tpu.dot_dimension_numbers<[1], [0], [0], [1], [0, 0, 1, 1], [], []>} : vector<8x32xf32>, vector<32x160xf32>, vector<8x160xf32> -> vector<8x160xf32>
    %42 = vector.broadcast %19 : vector<1x160xf32> to vector<8x160xf32>
    %43 = arith.addf %41, %42 : vector<8x160xf32>
    %44 = vector.extract_strided_slice %43 {offsets = [0, 128], sizes = [8, 32], strides = [1, 1]} : vector<8x160xf32> to vector<8x32xf32>
    %45 = math.tanh %44 : vector<8x32xf32>
    %46 = arith.index_cast %c1_i32 : i32 to index
    %c0_28 = arith.constant 0 : index
    %c0_29 = arith.constant 0 : index
    %47 = vector.load %arg12[%46, %c0_28, %c0_29] : memref<8x8x32xf32, #tpu.memory_space<vmem>>, vector<1x8x32xf32>
    %48 = vector.shape_cast %47 : vector<1x8x32xf32> to vector<8x32xf32>
    %49 = vector.shape_cast %45 : vector<8x32xf32> to vector<1x8x32xf32>
    tpu.vector_store %arg12[%46, %c0_28, %c0_29], %49 {strides = array<i32>} : memref<8x8x32xf32, #tpu.memory_space<vmem>>, vector<1x8x32xf32>,
    %50 = vector.extract_strided_slice %43 {offsets = [0, 0], sizes = [8, 32], strides = [1, 1]} : vector<8x160xf32> to vector<8x32xf32>
    %51 = arith.index_cast %c1_i32 : i32 to index
    %c0_30 = arith.constant 0 : index
    %c0_31 = arith.constant 0 : index
    %52 = vector.load %arg11[%51, %c0_30, %c0_31] : memref<8x8x32xf32, #tpu.memory_space<vmem>>, vector<1x8x32xf32>
    %53 = vector.shape_cast %52 : vector<1x8x32xf32> to vector<8x32xf32>
    %54 = arith.addf %50, %53 : vector<8x32xf32>
    %55 = math.tanh %54 : vector<8x32xf32>
    %56 = vector.broadcast %17 : vector<1x32xf32> to vector<8x32xf32>
    %57 = arith.mulf %56, %40 : vector<8x32xf32>
    %58 = vector.broadcast %15 : vector<1x32xf32> to vector<8x32xf32>
    %59 = arith.mulf %58, %55 : vector<8x32xf32>
    %60 = arith.addf %57, %59 : vector<8x32xf32>
    %c2_i32 = arith.constant 2 : i32
    %cst_32 = arith.constant dense<0.000000e+00> : vector<8x160xf32>
    %61 = tpu.matmul %60, %18, %cst_32 {dimension_numbers = #tpu.dot_dimension_numbers<[1], [0], [0], [1], [0, 0, 1, 1], [], []>} : vector<8x32xf32>, vector<32x160xf32>, vector<8x160xf32> -> vector<8x160xf32>
    %62 = vector.broadcast %19 : vector<1x160xf32> to vector<8x160xf32>
    %63 = arith.addf %61, %62 : vector<8x160xf32>
    %64 = vector.extract_strided_slice %63 {offsets = [0, 128], sizes = [8, 32], strides = [1, 1]} : vector<8x160xf32> to vector<8x32xf32>
    %65 = math.tanh %64 : vector<8x32xf32>
    %66 = arith.index_cast %c2_i32 : i32 to index
    %c0_33 = arith.constant 0 : index
    %c0_34 = arith.constant 0 : index
    %67 = vector.load %arg12[%66, %c0_33, %c0_34] : memref<8x8x32xf32, #tpu.memory_space<vmem>>, vector<1x8x32xf32>
    %68 = vector.shape_cast %67 : vector<1x8x32xf32> to vector<8x32xf32>
    %69 = vector.shape_cast %65 : vector<8x32xf32> to vector<1x8x32xf32>
    tpu.vector_store %arg12[%66, %c0_33, %c0_34], %69 {strides = array<i32>} : memref<8x8x32xf32, #tpu.memory_space<vmem>>, vector<1x8x32xf32>,
    %70 = vector.extract_strided_slice %63 {offsets = [0, 0], sizes = [8, 32], strides = [1, 1]} : vector<8x160xf32> to vector<8x32xf32>
    %71 = arith.index_cast %c2_i32 : i32 to index
    %c0_35 = arith.constant 0 : index
    %c0_36 = arith.constant 0 : index
    %72 = vector.load %arg11[%71, %c0_35, %c0_36] : memref<8x8x32xf32, #tpu.memory_space<vmem>>, vector<1x8x32xf32>
    %73 = vector.shape_cast %72 : vector<1x8x32xf32> to vector<8x32xf32>
    %74 = arith.addf %70, %73 : vector<8x32xf32>
    %75 = math.tanh %74 : vector<8x32xf32>
    %76 = vector.broadcast %17 : vector<1x32xf32> to vector<8x32xf32>
    %77 = arith.mulf %76, %60 : vector<8x32xf32>
    %78 = vector.broadcast %15 : vector<1x32xf32> to vector<8x32xf32>
    %79 = arith.mulf %78, %75 : vector<8x32xf32>
    %80 = arith.addf %77, %79 : vector<8x32xf32>
    %c3_i32 = arith.constant 3 : i32
    %cst_37 = arith.constant dense<0.000000e+00> : vector<8x160xf32>
    %81 = tpu.matmul %80, %18, %cst_37 {dimension_numbers = #tpu.dot_dimension_numbers<[1], [0], [0], [1], [0, 0, 1, 1], [], []>} : vector<8x32xf32>, vector<32x160xf32>, vector<8x160xf32> -> vector<8x160xf32>
    %82 = vector.broadcast %19 : vector<1x160xf32> to vector<8x160xf32>
    %83 = arith.addf %81, %82 : vector<8x160xf32>
    %84 = vector.extract_strided_slice %83 {offsets = [0, 128], sizes = [8, 32], strides = [1, 1]} : vector<8x160xf32> to vector<8x32xf32>
    %85 = math.tanh %84 : vector<8x32xf32>
    %86 = arith.index_cast %c3_i32 : i32 to index
    %c0_38 = arith.constant 0 : index
    %c0_39 = arith.constant 0 : index
    %87 = vector.load %arg12[%86, %c0_38, %c0_39] : memref<8x8x32xf32, #tpu.memory_space<vmem>>, vector<1x8x32xf32>
    %88 = vector.shape_cast %87 : vector<1x8x32xf32> to vector<8x32xf32>
    %89 = vector.shape_cast %85 : vector<8x32xf32> to vector<1x8x32xf32>
    tpu.vector_store %arg12[%86, %c0_38, %c0_39], %89 {strides = array<i32>} : memref<8x8x32xf32, #tpu.memory_space<vmem>>, vector<1x8x32xf32>,
    %90 = vector.extract_strided_slice %83 {offsets = [0, 0], sizes = [8, 32], strides = [1, 1]} : vector<8x160xf32> to vector<8x32xf32>
    %91 = arith.index_cast %c3_i32 : i32 to index
    %c0_40 = arith.constant 0 : index
    %c0_41 = arith.constant 0 : index
    %92 = vector.load %arg11[%91, %c0_40, %c0_41] : memref<8x8x32xf32, #tpu.memory_space<vmem>>, vector<1x8x32xf32>
    %93 = vector.shape_cast %92 : vector<1x8x32xf32> to vector<8x32xf32>
    %94 = arith.addf %90, %93 : vector<8x32xf32>
    %95 = math.tanh %94 : vector<8x32xf32>
    %96 = vector.broadcast %17 : vector<1x32xf32> to vector<8x32xf32>
    %97 = arith.mulf %96, %80 : vector<8x32xf32>
    %98 = vector.broadcast %15 : vector<1x32xf32> to vector<8x32xf32>
    %99 = arith.mulf %98, %95 : vector<8x32xf32>
    %100 = arith.addf %97, %99 : vector<8x32xf32>
    %c4_i32 = arith.constant 4 : i32
    %cst_42 = arith.constant dense<0.000000e+00> : vector<8x160xf32>
    %101 = tpu.matmul %100, %18, %cst_42 {dimension_numbers = #tpu.dot_dimension_numbers<[1], [0], [0], [1], [0, 0, 1, 1], [], []>} : vector<8x32xf32>, vector<32x160xf32>, vector<8x160xf32> -> vector<8x160xf32>
    %102 = vector.broadcast %19 : vector<1x160xf32> to vector<8x160xf32>
    %103 = arith.addf %101, %102 : vector<8x160xf32>
    %104 = vector.extract_strided_slice %103 {offsets = [0, 128], sizes = [8, 32], strides = [1, 1]} : vector<8x160xf32> to vector<8x32xf32>
    %105 = math.tanh %104 : vector<8x32xf32>
    %106 = arith.index_cast %c4_i32 : i32 to index
    %c0_43 = arith.constant 0 : index
    %c0_44 = arith.constant 0 : index
    %107 = vector.load %arg12[%106, %c0_43, %c0_44] : memref<8x8x32xf32, #tpu.memory_space<vmem>>, vector<1x8x32xf32>
    %108 = vector.shape_cast %107 : vector<1x8x32xf32> to vector<8x32xf32>
    %109 = vector.shape_cast %105 : vector<8x32xf32> to vector<1x8x32xf32>
    tpu.vector_store %arg12[%106, %c0_43, %c0_44], %109 {strides = array<i32>} : memref<8x8x32xf32, #tpu.memory_space<vmem>>, vector<1x8x32xf32>,
    %110 = vector.extract_strided_slice %103 {offsets = [0, 0], sizes = [8, 32], strides = [1, 1]} : vector<8x160xf32> to vector<8x32xf32>
    %111 = arith.index_cast %c4_i32 : i32 to index
    %c0_45 = arith.constant 0 : index
    %c0_46 = arith.constant 0 : index
    %112 = vector.load %arg11[%111, %c0_45, %c0_46] : memref<8x8x32xf32, #tpu.memory_space<vmem>>, vector<1x8x32xf32>
    %113 = vector.shape_cast %112 : vector<1x8x32xf32> to vector<8x32xf32>
    %114 = arith.addf %110, %113 : vector<8x32xf32>
    %115 = math.tanh %114 : vector<8x32xf32>
    %116 = vector.broadcast %17 : vector<1x32xf32> to vector<8x32xf32>
    %117 = arith.mulf %116, %100 : vector<8x32xf32>
    %118 = vector.broadcast %15 : vector<1x32xf32> to vector<8x32xf32>
    %119 = arith.mulf %118, %115 : vector<8x32xf32>
    %120 = arith.addf %117, %119 : vector<8x32xf32>
    %c5_i32 = arith.constant 5 : i32
    %cst_47 = arith.constant dense<0.000000e+00> : vector<8x160xf32>
    %121 = tpu.matmul %120, %18, %cst_47 {dimension_numbers = #tpu.dot_dimension_numbers<[1], [0], [0], [1], [0, 0, 1, 1], [], []>} : vector<8x32xf32>, vector<32x160xf32>, vector<8x160xf32> -> vector<8x160xf32>
    %122 = vector.broadcast %19 : vector<1x160xf32> to vector<8x160xf32>
    %123 = arith.addf %121, %122 : vector<8x160xf32>
    %124 = vector.extract_strided_slice %123 {offsets = [0, 128], sizes = [8, 32], strides = [1, 1]} : vector<8x160xf32> to vector<8x32xf32>
    %125 = math.tanh %124 : vector<8x32xf32>
    %126 = arith.index_cast %c5_i32 : i32 to index
    %c0_48 = arith.constant 0 : index
    %c0_49 = arith.constant 0 : index
    %127 = vector.load %arg12[%126, %c0_48, %c0_49] : memref<8x8x32xf32, #tpu.memory_space<vmem>>, vector<1x8x32xf32>
    %128 = vector.shape_cast %127 : vector<1x8x32xf32> to vector<8x32xf32>
    %129 = vector.shape_cast %125 : vector<8x32xf32> to vector<1x8x32xf32>
    tpu.vector_store %arg12[%126, %c0_48, %c0_49], %129 {strides = array<i32>} : memref<8x8x32xf32, #tpu.memory_space<vmem>>, vector<1x8x32xf32>,
    %130 = vector.extract_strided_slice %123 {offsets = [0, 0], sizes = [8, 32], strides = [1, 1]} : vector<8x160xf32> to vector<8x32xf32>
    %131 = arith.index_cast %c5_i32 : i32 to index
    %c0_50 = arith.constant 0 : index
    %c0_51 = arith.constant 0 : index
    %132 = vector.load %arg11[%131, %c0_50, %c0_51] : memref<8x8x32xf32, #tpu.memory_space<vmem>>, vector<1x8x32xf32>
    %133 = vector.shape_cast %132 : vector<1x8x32xf32> to vector<8x32xf32>
    %134 = arith.addf %130, %133 : vector<8x32xf32>
    %135 = math.tanh %134 : vector<8x32xf32>
    %136 = vector.broadcast %17 : vector<1x32xf32> to vector<8x32xf32>
    %137 = arith.mulf %136, %120 : vector<8x32xf32>
    %138 = vector.broadcast %15 : vector<1x32xf32> to vector<8x32xf32>
    %139 = arith.mulf %138, %135 : vector<8x32xf32>
    %140 = arith.addf %137, %139 : vector<8x32xf32>
    %c6_i32 = arith.constant 6 : i32
    %cst_52 = arith.constant dense<0.000000e+00> : vector<8x160xf32>
    %141 = tpu.matmul %140, %18, %cst_52 {dimension_numbers = #tpu.dot_dimension_numbers<[1], [0], [0], [1], [0, 0, 1, 1], [], []>} : vector<8x32xf32>, vector<32x160xf32>, vector<8x160xf32> -> vector<8x160xf32>
    %142 = vector.broadcast %19 : vector<1x160xf32> to vector<8x160xf32>
    %143 = arith.addf %141, %142 : vector<8x160xf32>
    %144 = vector.extract_strided_slice %143 {offsets = [0, 128], sizes = [8, 32], strides = [1, 1]} : vector<8x160xf32> to vector<8x32xf32>
    %145 = math.tanh %144 : vector<8x32xf32>
    %146 = arith.index_cast %c6_i32 : i32 to index
    %c0_53 = arith.constant 0 : index
    %c0_54 = arith.constant 0 : index
    %147 = vector.load %arg12[%146, %c0_53, %c0_54] : memref<8x8x32xf32, #tpu.memory_space<vmem>>, vector<1x8x32xf32>
    %148 = vector.shape_cast %147 : vector<1x8x32xf32> to vector<8x32xf32>
    %149 = vector.shape_cast %145 : vector<8x32xf32> to vector<1x8x32xf32>
    tpu.vector_store %arg12[%146, %c0_53, %c0_54], %149 {strides = array<i32>} : memref<8x8x32xf32, #tpu.memory_space<vmem>>, vector<1x8x32xf32>,
    %150 = vector.extract_strided_slice %143 {offsets = [0, 0], sizes = [8, 32], strides = [1, 1]} : vector<8x160xf32> to vector<8x32xf32>
    %151 = arith.index_cast %c6_i32 : i32 to index
    %c0_55 = arith.constant 0 : index
    %c0_56 = arith.constant 0 : index
    %152 = vector.load %arg11[%151, %c0_55, %c0_56] : memref<8x8x32xf32, #tpu.memory_space<vmem>>, vector<1x8x32xf32>
    %153 = vector.shape_cast %152 : vector<1x8x32xf32> to vector<8x32xf32>
    %154 = arith.addf %150, %153 : vector<8x32xf32>
    %155 = math.tanh %154 : vector<8x32xf32>
    %156 = vector.broadcast %17 : vector<1x32xf32> to vector<8x32xf32>
    %157 = arith.mulf %156, %140 : vector<8x32xf32>
    %158 = vector.broadcast %15 : vector<1x32xf32> to vector<8x32xf32>
    %159 = arith.mulf %158, %155 : vector<8x32xf32>
    %160 = arith.addf %157, %159 : vector<8x32xf32>
    %c7_i32 = arith.constant 7 : i32
    %cst_57 = arith.constant dense<0.000000e+00> : vector<8x160xf32>
    %161 = tpu.matmul %160, %18, %cst_57 {dimension_numbers = #tpu.dot_dimension_numbers<[1], [0], [0], [1], [0, 0, 1, 1], [], []>} : vector<8x32xf32>, vector<32x160xf32>, vector<8x160xf32> -> vector<8x160xf32>
    %162 = vector.broadcast %19 : vector<1x160xf32> to vector<8x160xf32>
    %163 = arith.addf %161, %162 : vector<8x160xf32>
    %164 = vector.extract_strided_slice %163 {offsets = [0, 128], sizes = [8, 32], strides = [1, 1]} : vector<8x160xf32> to vector<8x32xf32>
    %165 = math.tanh %164 : vector<8x32xf32>
    %166 = arith.index_cast %c7_i32 : i32 to index
    %c0_58 = arith.constant 0 : index
    %c0_59 = arith.constant 0 : index
    %167 = vector.load %arg12[%166, %c0_58, %c0_59] : memref<8x8x32xf32, #tpu.memory_space<vmem>>, vector<1x8x32xf32>
    %168 = vector.shape_cast %167 : vector<1x8x32xf32> to vector<8x32xf32>
    %169 = vector.shape_cast %165 : vector<8x32xf32> to vector<1x8x32xf32>
    tpu.vector_store %arg12[%166, %c0_58, %c0_59], %169 {strides = array<i32>} : memref<8x8x32xf32, #tpu.memory_space<vmem>>, vector<1x8x32xf32>,
    %170 = vector.extract_strided_slice %163 {offsets = [0, 0], sizes = [8, 32], strides = [1, 1]} : vector<8x160xf32> to vector<8x32xf32>
    %171 = arith.index_cast %c7_i32 : i32 to index
    %c0_60 = arith.constant 0 : index
    %c0_61 = arith.constant 0 : index
    %172 = vector.load %arg11[%171, %c0_60, %c0_61] : memref<8x8x32xf32, #tpu.memory_space<vmem>>, vector<1x8x32xf32>
    %173 = vector.shape_cast %172 : vector<1x8x32xf32> to vector<8x32xf32>
    %174 = arith.addf %170, %173 : vector<8x32xf32>
    %175 = math.tanh %174 : vector<8x32xf32>
    %176 = vector.broadcast %17 : vector<1x32xf32> to vector<8x32xf32>
    %177 = arith.mulf %176, %160 : vector<8x32xf32>
    %178 = vector.broadcast %15 : vector<1x32xf32> to vector<8x32xf32>
    %179 = arith.mulf %178, %175 : vector<8x32xf32>
    %180 = arith.addf %177, %179 : vector<8x32xf32>
    %c8_i32 = arith.constant 8 : i32
    %c0_62 = arith.constant 0 : index
    %c0_63 = arith.constant 0 : index
    %c0_64 = arith.constant 0 : index
    %181 = vector.load %arg12[%c0_62, %c0_63, %c0_64] : memref<8x8x32xf32, #tpu.memory_space<vmem>>, vector<8x8x32xf32>
    %182 = vector.shape_cast %181 : vector<8x8x32xf32> to vector<64x32xf32>
    %c0_65 = arith.constant 0 : index
    %c0_66 = arith.constant 0 : index
    %183 = vector.load %arg7[%c0_65, %c0_66] : memref<32x16xf32, #tpu.memory_space<vmem>>, vector<32x16xf32>
    %cst_67 = arith.constant dense<0.000000e+00> : vector<64x16xf32>
    %184 = tpu.matmul %182, %183, %cst_67 {dimension_numbers = #tpu.dot_dimension_numbers<[1], [0], [0], [1], [0, 0, 1, 1], [], []>} : vector<64x32xf32>, vector<32x16xf32>, vector<64x16xf32> -> vector<64x16xf32>
    %c0_68 = arith.constant 0 : index
    %c0_69 = arith.constant 0 : index
    %185 = vector.load %arg8[%c0_68, %c0_69] : memref<1x16xf32, #tpu.memory_space<vmem>>, vector<1x16xf32>
    %186 = vector.broadcast %185 : vector<1x16xf32> to vector<64x16xf32>
    %187 = arith.addf %184, %186 : vector<64x16xf32>
    %188 = vector.shape_cast %187 : vector<64x16xf32> to vector<8x8x16xf32>
    %c0_70 = arith.constant 0 : index
    %c0_71 = arith.constant 0 : index
    %c0_72 = arith.constant 0 : index
    %189 = vector.load %arg10[%c0_70, %c0_71, %c0_72] : memref<8x8x16xf32, #tpu.memory_space<vmem>>, vector<8x8x16xf32>
    tpu.vector_store %arg10[%c0_70, %c0_71, %c0_72], %188 {strides = array<i32>} : memref<8x8x16xf32, #tpu.memory_space<vmem>>, vector<8x8x16xf32>,
    return
  }
}

</mosaic_0001>

<bundles_post_ra>
// kernel: tpu_custom_call.1
= control target key start
LH: loop header
LB: loop body
LE: loop exit
PB: predicated region body
PF: predicated region fallthrough
CT: control target
= control target key end

     0   :  { %15 = vsyncpa [#allocation5], 0  ;;  %s2020_s0 = inlined_call_operand.hbm [shape: f32[8,8,16], index: 0, kind: input, shape index: {}]   ;;  %s2021_s1 = inlined_call_operand.hbm [shape: f32[16,32], index: 1, kind: input, shape index: {}]   ;;  %s2022_s2 = inlined_call_operand.hbm [shape: f32[1,32], index: 2, kind: input, shape index: {}]   ;;  %s2023_s3 = inlined_call_operand.hbm [shape: f32[32,32], index: 3, kind: input, shape index: {}]   ;;  %s2024_s4 = inlined_call_operand.hbm [shape: f32[1,32], index: 4, kind: input, shape index: {}]   ;;  %s2025_s5 = inlined_call_operand.vmem [shape: f32[32,160], index: 5, kind: input, shape index: {}]   ;;  %s2026_s6 = inlined_call_operand.vmem [shape: f32[1,160], index: 6, kind: input, shape index: {}]   ;;  %s2027_s7 = inlined_call_operand.vmem [shape: f32[32,16], index: 7, kind: input, shape index: {}]   ;;  %s2028_s8 = inlined_call_operand.vmem [shape: f32[1,16], index: 8, kind: input, shape index: {}]   ;;  %s2029_s9 = inlined_call_operand.vmem [shape: f32[1,32], index: 9, kind: input, shape index: {}]   ;;  %s2030_s10 = inlined_call_operand.hbm [shape: f32[8,8,16], index: 10, kind: output, shape index: {}]  }
   0x1   :  { %16 = vsyncpa [#allocation8], 0 }
   0x2   :  { %17 = vsyncpa [#allocation11], 0 }
   0x3   :  { %18 = vsyncpa [#allocation6], 0  ;;  %s1680_s13 = smov [#allocation7]   ;;  %s1681_s15 = smov [#allocation10]  }
   0x4   :  { %s36_s14 = sshll.u32 %s1680_s13, 4  ;;  %s58_s16 = sshll.u32 %s1681_s15, 4  ;;  %s37_s14 = int_to_ptr.vmem [resolvable:$true] %s36_s14  ;;  %s1744_s16 = int_to_ptr.vmem [resolvable:$true] %s58_s16 }
   0x5   :  { %s1540_s19 = scalar_lea.hbm %s2021_s1, 256 }
   0x6   :  { %p1541_p0 = scmp.ne.s32.totalorder %s2021_s1, %s1540_s19  ;;  %p1544_p1 = scmp.lt.u32.totalorder %s1540_s19, %s2021_s1 }
   0x8   :  { %p1546_p2 = pnand %p1544_p1, %p1541_p0 }
   0xa   :  { %1549 = shalt.err (!%p1546_p2)
}
   0xb   :  { %s1550_s24 = scalar_lea.vmem %s37_s14, 256  ;;  %p1555_p4 = scmp.lt.s32.totalorder %s37_s14, %s37_s14 }
   0xc   :  { %p1551_p3 = scmp.ne.s32.totalorder %s37_s14, %s1550_s24  ;;  %p1556_p5 = scmp.lt.s32.totalorder %s1550_s24, %s1550_s24 }
   0xe   :  { %p1557_p6 = por %p1556_p5, %p1555_p4 }
  0x10   :  { %p1558_p7 = pnand %p1557_p6, %p1551_p3 }
  0x12   :  { %1561 = shalt.err (!%p1558_p7)
}
  0x13   :  { %s1682_s25 = smov 128   ;;  %s1683_s26 = smov 8  }
  0x14   :  { %42 = dma.hbm_to_vmem [thread:$0]  %s2021_s1, 256, %s37_s14, [#allocation8], %s1682_s25, %s1682_s25, %s1683_s26  }
  0x15   :  { %s1562_s11 = scalar_lea.hbm %s2023_s3, 512 }
  0x16   :  { %p1563_p8 = scmp.ne.s32.totalorder %s2023_s3, %s1562_s11  ;;  %p1566_p9 = scmp.lt.u32.totalorder %s1562_s11, %s2023_s3 }
  0x18   :  { %p1568_p10 = pnand %p1566_p9, %p1563_p8 }
  0x1a   :  { %1571 = shalt.err (!%p1568_p10)
}
  0x1b   :  { %s1572_s18 = scalar_lea.vmem %s1744_s16, 512  ;;  %p1577_p12 = scmp.lt.s32.totalorder %s1744_s16, %s1744_s16 }
  0x1c   :  { %p1573_p11 = scmp.ne.s32.totalorder %s1744_s16, %s1572_s18  ;;  %p1578_p13 = scmp.lt.s32.totalorder %s1572_s18, %s1572_s18 }
  0x1e   :  { %p1579_p0 = por %p1578_p13, %p1577_p12 }
  0x20   :  { %p1580_p1 = pnand %p1579_p0, %p1573_p11 }
  0x22   :  { %1583 = shalt.err (!%p1580_p1)
}
  0x23   :  { %64 = dma.hbm_to_vmem [thread:$0]  %s2023_s3, 512, %s1744_s16, [#allocation11], %s1682_s25, %s1682_s25, %s1683_s26  }
  0x24   :  { %s1684_s19 = smov [#allocation4]   ;;  %s1685_s21 = smov [#allocation9]  }
  0x25   :  { %s24_s20 = sshll.u32 %s1684_s19, 4  ;;  %s49_s22 = sshll.u32 %s1685_s21, 4  ;;  %s25_s20 = int_to_ptr.vmem [resolvable:$true] %s24_s20  ;;  %s50_s22 = int_to_ptr.vmem [resolvable:$true] %s49_s22 }
  0x26   :  { %s1584_s27 = scalar_lea.hbm %s2020_s0, 1024 }
  0x27   :  { %p1585_p2 = scmp.ne.s32.totalorder %s2020_s0, %s1584_s27  ;;  %p1588_p3 = scmp.lt.u32.totalorder %s1584_s27, %s2020_s0 }
  0x29   :  { %p1590_p4 = pnand %p1588_p3, %p1585_p2 }
  0x2b   :  { %1593 = shalt.err (!%p1590_p4)
}
  0x2c   :  { %s1594_s3 = scalar_lea.vmem %s25_s20, 1024  ;;  %p1599_p6 = scmp.lt.s32.totalorder %s25_s20, %s25_s20 }
  0x2d   :  { %p1595_p5 = scmp.ne.s32.totalorder %s25_s20, %s1594_s3  ;;  %p1600_p7 = scmp.lt.s32.totalorder %s1594_s3, %s1594_s3 }
  0x2f   :  { %p1601_p8 = por %p1600_p7, %p1599_p6 }
  0x31   :  { %p1602_p9 = pnand %p1601_p8, %p1595_p5 }
  0x33   :  { %1605 = shalt.err (!%p1602_p9)
}
  0x34   :  { %30 = dma.hbm_to_vmem [thread:$0]  %s2020_s0, 1024, %s25_s20, [#allocation5], %s1682_s25, %s1682_s25, %s1683_s26  }
  0x35   :  { %s1606_s17 = scalar_lea.hbm %s2022_s2, 16 }
  0x36   :  { %p1607_p10 = scmp.ne.s32.totalorder %s2022_s2, %s1606_s17  ;;  %p1610_p11 = scmp.lt.u32.totalorder %s1606_s17, %s2022_s2 }
  0x38   :  { %p1612_p12 = pnand %p1610_p11, %p1607_p10 }
  0x3a   :  { %1615 = shalt.err (!%p1612_p12)
}
  0x3b   :  { %s1616_s21 = scalar_lea.vmem %s50_s22, 16  ;;  %s1620_s23 = scalar_lea.vmem %s50_s22, 32 }
  0x3c   :  { %p1617_p13 = scmp.ne.s32.totalorder %s50_s22, %s1616_s21  ;;  %p1621_p0 = scmp.lt.s32.totalorder %s50_s22, %s50_s22 }
  0x3d   :  { %p1622_p1 = scmp.lt.s32.totalorder %s1620_s23, %s1616_s21 }
  0x3f   :  { %p1623_p2 = por %p1622_p1, %p1621_p0 }
  0x41   :  { %p1624_p3 = pnand %p1623_p2, %p1617_p13 }
  0x43   :  { %1627 = shalt.err (!%p1624_p3)
}
  0x44   :  { %52 = dma.hbm_to_vmem [thread:$0]  %s2022_s2, 16, %s50_s22, [#allocation8]  }
  0x45   :  { %s1686_s24 = smov [#allocation12]   ;;  %s1628_s30 = scalar_lea.hbm %s2024_s4, 16 }
  0x46   :  { %s71_s27 = sshll.u32 %s1686_s24, 4  ;;  %p1629_p4 = scmp.ne.s32.totalorder %s2024_s4, %s1628_s30  ;;  %s72_s27 = int_to_ptr.vmem [resolvable:$true] %s71_s27 }
  0x47   :  { %p1632_p5 = scmp.lt.u32.totalorder %s1628_s30, %s2024_s4 }
  0x49   :  { %p1634_p6 = pnand %p1632_p5, %p1629_p4 }
  0x4b   :  { %1637 = shalt.err (!%p1634_p6)
}
  0x4c   :  { %s1638_s13 = scalar_lea.vmem %s72_s27, 16  ;;  %s1642_s2 = scalar_lea.vmem %s72_s27, 32 }
  0x4d   :  { %p1639_p7 = scmp.ne.s32.totalorder %s72_s27, %s1638_s13  ;;  %p1643_p8 = scmp.lt.s32.totalorder %s72_s27, %s72_s27 }
  0x4e   :  { %p1644_p9 = scmp.lt.s32.totalorder %s1642_s2, %s1638_s13 }
  0x50   :  { %p1645_p10 = por %p1644_p9, %p1643_p8 }
  0x52   :  { %p1646_p11 = pnand %p1645_p10, %p1639_p7 }
  0x54   :  { %1649 = shalt.err (!%p1646_p11)
}
  0x55   :  { %74 = dma.hbm_to_vmem [thread:$0]  %s2024_s4, 16, %s72_s27, [#allocation11]  }
  0x56   :  { %1672 = dma.done.wait [#allocation5], 1024  }
  0x57   :  { %1673 = vsyncadd [#allocation5], 4294966272 }
  0x58   :  { %1674 = dma.done.wait [#allocation8], 272  }
  0x59   :  { %1675 = vsyncadd [#allocation8], 4294967024 }
  0x5a   :  { %1676 = dma.done.wait [#allocation11], 528  }
  0x5b   :  { %1677 = vsyncadd [#allocation11], 4294966768  ;;  %vm117_vm0 = vcmask 130048   ;;  %v108_v0 = vld [vmem:[#allocation7] sm:$0xff]  ;;  %v109_v1 = vld [vmem:[#allocation7 + $0x8] sm:$0xff]  ;;  %v1687_v28 = vmov 0.0   ;;  %v416_v52 = vlaneseq }
  0x5c   :  { %v100_v2 = vld [vmem:[#allocation4] sm:$0xff]  ;;  %v1399_v3 = vpack.c.bf16 %v109_v1, %v108_v0  ;;  %v101_v4 = vld [vmem:[#allocation4 + $0x8] sm:$0xff]  ;;  %v102_v5 = vld [vmem:[#allocation4 + $0x10] sm:$0xff]  ;;  %vm266_vm1 = vcmask 261120  }
  0x5d   :  { %1347 = vmatprep.mubr.msk.f32.mxu0 %vm117_vm0, %v100_v2  ;;  %v103_v6 = vld [vmem:[#allocation4 + $0x18] sm:$0xff]  ;;  %v104_v7 = vld [vmem:[#allocation4 + $0x20] sm:$0xff]  ;;  %v105_v8 = vld [vmem:[#allocation4 + $0x28] sm:$0xff]  ;;  %v417_v54 = vshrl.u32 %v416_v52, 7 }
  0x5e   :  { %1400 = vmatprep.subr.bf16.mxu0 %v1399_v3  ;;  %1483 = vmatprep.subr.bf16.mxu1 %v1399_v3  ;;  %v255_v9 = vld [vmem:[#allocation10] sm:$0xff]  ;;  %v256_v10 = vld [vmem:[#allocation10 + $0x8] sm:$0xff]  ;;  %v257_v13 = vld [vmem:[#allocation10 + $0x10] sm:$0xff] }
  0x5f   :  { %1402 = vmatpush3.bf16.msra.mxu0 %v1399_v3  ;;  %1484 = vmatpush3.bf16.msra.mxu1 %v1399_v3  ;;  %v1403_v11 = vpack.c.bf16 %v256_v10, %v255_v9  ;;  %v106_v12 = vld [vmem:[#allocation4 + $0x30] sm:$0xff]  ;;  %v107_v14 = vld [vmem:[#allocation4 + $0x38] sm:$0xff]  ;;  %v407_v17 = vld [vmem:[%s2025_s5 + $0x8] sm:$0xff]  ;;  %v418_v57 = vsub.s32 0, %v417_v54  ;;  %v422_v58 = vsub.s32 1, %v417_v54 }
  0x60   :  { %1353 = vmatprep.mubr.msk.f32.mxu1 %vm117_vm0, %v104_v7  ;;  %v258_v15 = vld [vmem:[#allocation10 + $0x18] sm:$0xff]  ;;  %v409_v18 = vld [vmem:[%s2025_s5 + $0x18] sm:$0xff]  ;;  %v406_v20 = vld [vmem:[%s2025_s5] sm:$0xff] }
  0x61   :  { %1404 = vmatprep.subr.bf16.mxu1 %v1403_v11  ;;  %v1407_v16 = vpack.c.bf16 %v258_v15, %v257_v13  ;;  %v1834_v19 = vpack.c.bf16 %v409_v18, %v407_v17  ;;  %v408_v21 = vld [vmem:[%s2025_s5 + $0x10] sm:$0xff]  ;;  %v411_v23 = vld [vmem:[%s2025_s5 + $0x28] sm:$0xff]  ;;  %v413_v24 = vld [vmem:[%s2025_s5 + $0x38] sm:$0xff] }
  0x62   :  { %1348 = vmatmul.mubr.msk.f32.vlgmr.msra.gmra.mrb[0].mxu0 %vm117_vm0, %v101_v4  ;;  %1354 = vmatmul.mubr.msk.f32.vlgmr.msra.gmra.mrb[0].mxu1 %vm117_vm0, %v105_v8  ;;  %v1842_v22 = vpack.c.bf16 %v408_v21, %v406_v20  ;;  %v410_v25 = vld [vmem:[%s2025_s5 + $0x20] sm:$0xff]  ;;  %v1856_v26 = vpack.c.bf16 %v413_v24, %v411_v23  ;;  %v412_v27 = vld [vmem:[%s2025_s5 + $0x30] sm:$0xff] }
  0x63   :  { %1350 = vmatprep.mubr.msk.f32.mxu0 %vm117_vm0, %v102_v5  ;;  %1356 = vmatprep.mubr.msk.f32.mxu1 %vm117_vm0, %v106_v12  ;;  %v1862_v29 = vpack.c.bf16 %v412_v27, %v410_v25  ;;  %v1275_v30 = vld [vmem:[#allocation9] ss:$0 sm:$0xff]  ;;  %v414_v55 = vld [vmem:[%s2026_s6] sm:$0x3]  ;;  %v1284_v2 = vld [vmem:[#allocation12] ss:$0 sm:$0xff] }
  0x64   :  { %1406 = vmatpush3.bf16.msra.mxu1 %v1403_v11  ;;  %1412 = vmatprep.subr.bf16.mxu0 %v1834_v19  ;;  %v1887_v60 = vrot.slane %v414_v55, %v418_v57  ;;  %v1889_v61 = vrot.slane %v414_v55, %v422_v58  ;;  %v404_v9 = vld [vmem:[%s2029_s9] sm:$0x1] }
  0x65   :  { %1408 = vmatprep.subr.bf16.mxu1 %v1407_v16  ;;  %1414 = vmatpush1.bf16.msra.mxu0 %v1842_v22  ;;  %v405_v11 = vsub.f32 1.0, %v404_v9  ;;  %v1903_v13 = vrot.slane %v404_v9, %v418_v57 }
  0x66   :  { %1351 = vmatmul.mubr.msk.f32.gmra.mrb[2].mxu0 %vm117_vm0, %v103_v6  ;;  %1357 = vmatmul.mubr.msk.f32.gmra.mrb[2].mxu1 %vm117_vm0, %v107_v14 }
  0x67   :  { %493 = vmatprep.mubr.f32.mxu0 %v1687_v28  ;;  %1416 = vmatprep.subr.bf16.mxu0 %v1856_v26  ;;  %v1901_v12 = vrot.slane %v405_v11, %v418_v57 }
  0x68   :  { %1410 = vmatpush3.bf16.msra.mxu1 %v1407_v16 }
  0x69   :  { %1420 = vmatprep.subr.bf16.mxu1 %v1834_v19  ;;  %1418 = vmatpush1.bf16.msra.mxu0 %v1862_v29  ;;  %v511_v14 = vmul.f32 0.0, %v1901_v12 }
  0x6a   :  { %1428 = vmatprep.subr.bf16.mxu0 %v1834_v19 }
  0x6c   :  { %494 = vmatmul.mubr.f32.vlgmr.msra.gmra.mrb[4].mxu0 %v1687_v28 }
  0x6d   :  { %1430 = vmatpush1.bf16.msra.mxu0 %v1842_v22  ;;  %671 = vmatprep.mubr.f32.mxu0 %v1687_v28 }
  0x6e   :  { %1432 = vmatprep.subr.bf16.mxu0 %v1856_v26 }
  0x71   :  { %1434 = vmatpush1.bf16.msra.mxu0 %v1862_v29 }
  0x72   :  { %1444 = vmatprep.subr.bf16.mxu0 %v1834_v19 }
 0x135   :  { %v1349_v31 = vpop.f32.mrb[0].mxu0  ;;  %v1355_v41 = vpop.f32.mrb[0].mxu1 }
 0x136   :  { %v214_v32 = vadd.f32 %v1349_v31, %v1275_v30  ;;  %v208_v33 = vpop.f32.mrb[1].mxu0  ;;  %v234_v42 = vadd.f32 %v1355_v41, %v1275_v30  ;;  %v228_v43 = vpop.f32.mrb[1].mxu1 }
 0x137   :  { %v209_v34 = vadd.f32 %v1275_v30, %v208_v33  ;;  %v229_v44 = vadd.f32 %v1275_v30, %v228_v43 }
 0x139   :  { %1494 = vtanh.f32 %v209_v34  ;;  %v1352_v37 = vpop.f32.mrb[2].mxu0  ;;  %v1358_v45 = vpop.f32.mrb[2].mxu1 }
 0x13a   :  { %1496 = vtanh.f32 %v214_v32  ;;  %v224_v38 = vadd.f32 %v1352_v37, %v1275_v30  ;;  %v218_v39 = vpop.f32.mrb[3].mxu0  ;;  %v244_v46 = vadd.f32 %v1358_v45, %v1275_v30  ;;  %v238_v47 = vpop.f32.mrb[3].mxu1 }
 0x13b   :  { %v219_v40 = vadd.f32 %v1275_v30, %v218_v39  ;;  %v239_v48 = vadd.f32 %v1275_v30, %v238_v47 }
 0x13c   :  { %1498 = vtanh.f32 %v224_v38 }
 0x13d   :  { %1500 = vtanh.f32 %v219_v40 }
 0x13e   :  { %1502 = vtanh.f32 %v234_v42 }
 0x13f   :  { %1504 = vtanh.f32 %v229_v44  ;;  %v495_v62 = vpop.f32.mrb[4].mxu0 }
 0x140   :  { %1506 = vtanh.f32 %v244_v46  ;;  %v497_v63 = vpop.f32.mrb[5].mxu0  ;;  %v496_v7 = vadd.f32 %v495_v62, %v1887_v60 }
 0x141   :  { %1508 = vtanh.f32 %v239_v48  ;;  %v498_v0 = vadd.f32 %v497_v63, %v1889_v61 }
 0x143   :  { %v1495_v35 = vpop.eup %1494  ;;  %1510 = vtanh.f32 %v498_v0 }
 0x144   :  { %v1497_v36 = vpop.eup %1496  ;;  %1367 = vmatprep.mubr.msk.f32.mxu1 %vm266_vm1, %v1495_v35 }
 0x145   :  { %1368 = vmatmul.mubr.msk.f32.vlgmr.msra.gmra.mrb[4].mxu1 %vm266_vm1, %v1497_v36 }
 0x146   :  { %1422 = vmatpush1.bf16.msra.mxu1 %v1842_v22  ;;  %v1499_v49 = vpop.eup %1498 }
 0x147   :  { %1424 = vmatprep.subr.bf16.mxu1 %v1856_v26  ;;  %v1501_v50 = vpop.eup %1500 }
 0x148   :  { %1370 = vmatprep.mubr.msk.f32.mxu1 %vm266_vm1, %v1501_v50  ;;  %v1503_v51 = vpop.eup %1502 }
 0x149   :  { %1371 = vmatmul.mubr.msk.f32.gmra.mrb[6].mxu1 %vm266_vm1, %v1499_v49  ;;  %v1505_v53 = vpop.eup %1504 }
 0x14a   :  { %1426 = vmatpush1.bf16.msra.mxu1 %v1862_v29  ;;  %1373 = vmatprep.mubr.msk.f32.mxu1 %vm266_vm1, %v1505_v53  ;;  %v1507_v56 = vpop.eup %1506 }
 0x14b   :  { %1436 = vmatprep.subr.bf16.mxu1 %v1834_v19  ;;  %v1509_v59 = vpop.eup %1508 }
 0x14d   :  { %1374 = vmatmul.mubr.msk.f32.gmra.mrb[8].mxu1 %vm266_vm1, %v1503_v51  ;;  %v1511_v1 = vpop.eup %1510 }
 0x14e   :  { %1376 = vmatprep.mubr.msk.f32.mxu1 %vm266_vm1, %v1509_v59  ;;  %501 = vst.msk [vmem:[#allocation3] sm:$0xff] %vm266_vm1, %v1511_v1 }
 0x151   :  { %1377 = vmatmul.mubr.msk.f32.gmra.mrb[10].mxu1 %vm266_vm1, %v1507_v56 }
 0x152   :  { %587 = vmatprep.mubr.f32.mxu1 %v1687_v28 }
 0x218   :  { %v1369_v3 = vpop.f32.mrb[4].mxu1 }
 0x219   :  { %v363_v4 = vadd.f32 %v1369_v3, %v1284_v2  ;;  %v357_v5 = vpop.f32.mrb[5].mxu1 }
 0x21a   :  { %v358_v6 = vadd.f32 %v1284_v2, %v357_v5 }
 0x21b   :  { %397 = vst.msk [vmem:[#allocation2 + $0x8] sm:$0xff] %vm266_vm1, %v363_v4 }
 0x21c   :  { %396 = vst.msk [vmem:[#allocation2] sm:$0xff] %vm266_vm1, %v358_v6  ;;  %v1372_v18 = vpop.f32.mrb[6].mxu1 }
 0x21d   :  { %v373_v20 = vadd.f32 %v1372_v18, %v1284_v2  ;;  %v367_v21 = vpop.f32.mrb[7].mxu1  ;;  %v1109_v18 = vld [vmem:[%s2027_s7 + $0x8] sm:$0xff] }
 0x21e   :  { %v368_v23 = vadd.f32 %v1284_v2, %v367_v21 }
 0x21f   :  { %399 = vst.msk [vmem:[#allocation2 + $0x18] sm:$0xff] %vm266_vm1, %v373_v20 }
 0x220   :  { %398 = vst.msk [vmem:[#allocation2 + $0x10] sm:$0xff] %vm266_vm1, %v368_v23  ;;  %v1375_v24 = vpop.f32.mrb[8].mxu1 }
 0x221   :  { %v383_v25 = vadd.f32 %v1375_v24, %v1284_v2  ;;  %v377_v27 = vpop.f32.mrb[9].mxu1 }
 0x222   :  { %v378_v30 = vadd.f32 %v1284_v2, %v377_v27  ;;  %v598_v37 = vld [vmem:[#allocation2 + $0x8] sm:$0xff]  ;;  %v1110_v27 = vld [vmem:[%s2027_s7 + $0x10] sm:$0xff] }
 0x223   :  { %v502_v8 = vld [vmem:[#allocation2] sm:$0xff]  ;;  %401 = vst.msk [vmem:[#allocation2 + $0x28] sm:$0xff] %vm266_vm1, %v383_v25 }
 0x224   :  { %v503_v10 = vadd.f32 %v502_v8, %v496_v7  ;;  %400 = vst.msk [vmem:[#allocation2 + $0x20] sm:$0xff] %vm266_vm1, %v378_v30  ;;  %v1378_v31 = vpop.f32.mrb[10].mxu1  ;;  %v1111_v30 = vld [vmem:[%s2027_s7 + $0x18] sm:$0xff] }
 0x225   :  { %v387_v32 = vpop.f32.mrb[11].mxu1 }
 0x226   :  { %1512 = vtanh.f32 %v503_v10  ;;  %v388_v33 = vadd.f32 %v1284_v2, %v387_v32  ;;  %v766_v59 = vld [vmem:[#allocation2 + $0x18] sm:$0xff] }
 0x227   :  { %v682_v48 = vld [vmem:[#allocation2 + $0x10] sm:$0xff] }
 0x228   :  { %402 = vst.msk [vmem:[#allocation2 + $0x30] sm:$0xff] %vm266_vm1, %v388_v33 }
 0x22a   :  { %v934_v24 = vld [vmem:[#allocation2 + $0x28] sm:$0xff] }
 0x22b   :  { %v850_v7 = vld [vmem:[#allocation2 + $0x20] sm:$0xff] }
 0x230   :  { %v1513_v15 = vpop.eup %1512 }
 0x231   :  { %v518_v16 = vmul.f32 %v1513_v15, %v1903_v13 }
 0x233   :  { %v519_v17 = vadd.f32 %v518_v16, %v511_v14 }
 0x235   :  { %1293 = vmatmul.mubr.msk.f32.vlgmr.msra.gmra.mrb[12].mxu1 %vm266_vm1, %v519_v17  ;;  %v601_v42 = vmul.f32 %v519_v17, %v1901_v12  ;;  %v1108_v17 = vld [vmem:[%s2027_s7] sm:$0xff] }
 0x236   :  { %1438 = vmatpush1.bf16.msra.mxu1 %v1842_v22  ;;  %755 = vmatprep.mubr.f32.mxu1 %v1687_v28  ;;  %v1475_v20 = vpack.c.bf16 %v1109_v18, %v1108_v17 }
 0x237   :  { %1440 = vmatprep.subr.bf16.mxu1 %v1856_v26 }
 0x23a   :  { %1442 = vmatpush1.bf16.msra.mxu1 %v1862_v29 }
 0x23b   :  { %1452 = vmatprep.subr.bf16.mxu1 %v1834_v19 }
 0x308   :  { %v589_v34 = vpop.f32.mrb[12].mxu1 }
 0x309   :  { %v590_v35 = vadd.f32 %v589_v34, %v1887_v60  ;;  %v591_v36 = vpop.f32.mrb[13].mxu1  ;;  %v1479_v34 = vpack.c.bf16 %v1111_v30, %v1110_v27 }
 0x30a   :  { %v592_v38 = vadd.f32 %v591_v36, %v1889_v61 }
 0x30b   :  { %v599_v39 = vadd.f32 %v598_v37, %v590_v35  ;;  %v1100_v35 = vld [vmem:[#allocation3] sm:$0xff] }
 0x30c   :  { %1514 = vtanh.f32 %v592_v38 }
 0x30d   :  { %1516 = vtanh.f32 %v599_v39 }
 0x316   :  { %v1515_v40 = vpop.eup %1514 }
 0x317   :  { %v1517_v41 = vpop.eup %1516  ;;  %596 = vst.msk [vmem:[#allocation3 + $0x8] sm:$0xff] %vm266_vm1, %v1515_v40 }
 0x318   :  { %v602_v43 = vmul.f32 %v1517_v41, %v1903_v13 }
 0x31a   :  { %v603_v44 = vadd.f32 %v602_v43, %v601_v42 }
 0x31c   :  { %1294 = vmatmul.mubr.msk.f32.vlgmr.msra.gmra.mrb[6].mxu0 %vm266_vm1, %v603_v44  ;;  %v685_v53 = vmul.f32 %v603_v44, %v1901_v12  ;;  %v1018_v44 = vld [vmem:[#allocation2 + $0x30] sm:$0xff] }
 0x31d   :  { %1446 = vmatpush1.bf16.msra.mxu0 %v1842_v22  ;;  %839 = vmatprep.mubr.f32.mxu0 %v1687_v28 }
 0x31e   :  { %1448 = vmatprep.subr.bf16.mxu0 %v1856_v26  ;;  %v1101_v36 = vld [vmem:[#allocation3 + $0x8] sm:$0xff] }
 0x321   :  { %1450 = vmatpush1.bf16.msra.mxu0 %v1862_v29 }
 0x322   :  { %1460 = vmatprep.subr.bf16.mxu0 %v1834_v19 }
 0x3ef   :  { %v673_v45 = vpop.f32.mrb[6].mxu0 }
 0x3f0   :  { %v674_v46 = vadd.f32 %v673_v45, %v1887_v60  ;;  %v675_v47 = vpop.f32.mrb[7].mxu0 }
 0x3f1   :  { %v676_v49 = vadd.f32 %v675_v47, %v1889_v61  ;;  %v1300_v47 = vld [vmem:[%s2028_s8] ss:$0 sm:$0xff]  ;;  %s1688_s8 = smov [#allocation13]  }
 0x3f2   :  { %v683_v50 = vadd.f32 %v682_v48, %v674_v46  ;;  %s1261_s1 = sshll.u32 %s1688_s8, 4  ;;  %s1262_s1 = int_to_ptr.vmem [resolvable:$true] %s1261_s1 }
 0x3f3   :  { %1518 = vtanh.f32 %v676_v49  ;;  %s1650_s14 = scalar_lea.vmem %s1262_s1, 1024  ;;  %p1655_p13 = scmp.lt.s32.totalorder %s1262_s1, %s1262_s1 }
 0x3f4   :  { %1520 = vtanh.f32 %v683_v50  ;;  %p1651_p12 = scmp.ne.s32.totalorder %s1262_s1, %s1650_s14  ;;  %p1656_p0 = scmp.lt.s32.totalorder %s1650_s14, %s1650_s14 }
 0x3f6   :  { %p1657_p1 = por %p1656_p0, %p1655_p13 }
 0x3f8   :  { %p1658_p2 = pnand %p1657_p1, %p1651_p12 }
 0x3fd   :  { %v1519_v51 = vpop.eup %1518 }
 0x3fe   :  { %v1521_v52 = vpop.eup %1520  ;;  %680 = vst.msk [vmem:[#allocation3 + $0x10] sm:$0xff] %vm266_vm1, %v1519_v51 }
 0x3ff   :  { %v686_v54 = vmul.f32 %v1521_v52, %v1903_v13 }
 0x401   :  { %v687_v55 = vadd.f32 %v686_v54, %v685_v53 }
 0x403   :  { %1295 = vmatmul.mubr.msk.f32.vlgmr.msra.gmra.mrb[14].mxu1 %vm266_vm1, %v687_v55  ;;  %v769_v2 = vmul.f32 %v687_v55, %v1901_v12 }
 0x404   :  { %1454 = vmatpush1.bf16.msra.mxu1 %v1842_v22  ;;  %923 = vmatprep.mubr.f32.mxu1 %v1687_v28 }
 0x405   :  { %1456 = vmatprep.subr.bf16.mxu1 %v1856_v26  ;;  %v1102_v37 = vld [vmem:[#allocation3 + $0x10] sm:$0xff] }
 0x408   :  { %1458 = vmatpush1.bf16.msra.mxu1 %v1862_v29 }
 0x409   :  { %1468 = vmatprep.subr.bf16.mxu1 %v1834_v19 }
 0x4d6   :  { %v757_v56 = vpop.f32.mrb[14].mxu1 }
 0x4d7   :  { %v758_v57 = vadd.f32 %v757_v56, %v1887_v60  ;;  %v759_v58 = vpop.f32.mrb[15].mxu1 }
 0x4d8   :  { %v760_v62 = vadd.f32 %v759_v58, %v1889_v61 }
 0x4d9   :  { %v767_v63 = vadd.f32 %v766_v59, %v758_v57 }
 0x4da   :  { %1522 = vtanh.f32 %v760_v62 }
 0x4db   :  { %1524 = vtanh.f32 %v767_v63 }
 0x4e4   :  { %v1523_v0 = vpop.eup %1522 }
 0x4e5   :  { %v1525_v1 = vpop.eup %1524  ;;  %764 = vst.msk [vmem:[#allocation3 + $0x18] sm:$0xff] %vm266_vm1, %v1523_v0 }
 0x4e6   :  { %v770_v3 = vmul.f32 %v1525_v1, %v1903_v13 }
 0x4e8   :  { %v771_v4 = vadd.f32 %v770_v3, %v769_v2 }
 0x4ea   :  { %1296 = vmatmul.mubr.msk.f32.vlgmr.msra.gmra.mrb[8].mxu0 %vm266_vm1, %v771_v4  ;;  %v853_v14 = vmul.f32 %v771_v4, %v1901_v12 }
 0x4eb   :  { %1462 = vmatpush1.bf16.msra.mxu0 %v1842_v22  ;;  %1007 = vmatprep.mubr.f32.mxu0 %v1687_v28 }
 0x4ec   :  { %1464 = vmatprep.subr.bf16.mxu0 %v1856_v26  ;;  %v1103_v38 = vld [vmem:[#allocation3 + $0x18] sm:$0xff] }
 0x4ef   :  { %1466 = vmatpush1.bf16.msra.mxu0 %v1862_v29 }
 0x4f0   :  { %1476 = vmatprep.subr.bf16.mxu0 %v1475_v20 }
 0x5bd   :  { %v841_v19 = vpop.f32.mrb[8].mxu0 }
 0x5be   :  { %v842_v5 = vadd.f32 %v841_v19, %v1887_v60  ;;  %v843_v6 = vpop.f32.mrb[9].mxu0 }
 0x5bf   :  { %v844_v8 = vadd.f32 %v843_v6, %v1889_v61 }
 0x5c0   :  { %v851_v9 = vadd.f32 %v850_v7, %v842_v5 }
 0x5c1   :  { %1526 = vtanh.f32 %v844_v8 }
 0x5c2   :  { %1528 = vtanh.f32 %v851_v9 }
 0x5cb   :  { %v1527_v10 = vpop.eup %1526 }
 0x5cc   :  { %v1529_v11 = vpop.eup %1528  ;;  %848 = vst.msk [vmem:[#allocation3 + $0x20] sm:$0xff] %vm266_vm1, %v1527_v10 }
 0x5cd   :  { %v854_v15 = vmul.f32 %v1529_v11, %v1903_v13 }
 0x5cf   :  { %v855_v16 = vadd.f32 %v854_v15, %v853_v14 }
 0x5d1   :  { %1297 = vmatmul.mubr.msk.f32.vlgmr.msra.gmra.mrb[16].mxu1 %vm266_vm1, %v855_v16  ;;  %v937_v31 = vmul.f32 %v855_v16, %v1901_v12 }
 0x5d2   :  { %1470 = vmatpush1.bf16.msra.mxu1 %v1842_v22  ;;  %1091 = vmatprep.mubr.f32.mxu1 %v1687_v28 }
 0x5d3   :  { %1472 = vmatprep.subr.bf16.mxu1 %v1856_v26  ;;  %v1104_v39 = vld [vmem:[#allocation3 + $0x20] sm:$0xff] }
 0x5d6   :  { %1474 = vmatpush1.bf16.msra.mxu1 %v1862_v29 }
 0x6a4   :  { %v925_v21 = vpop.f32.mrb[16].mxu1 }
 0x6a5   :  { %v926_v23 = vadd.f32 %v925_v21, %v1887_v60  ;;  %v927_v22 = vpop.f32.mrb[17].mxu1 }
 0x6a6   :  { %v928_v28 = vadd.f32 %v927_v22, %v1889_v61 }
 0x6a7   :  { %v935_v26 = vadd.f32 %v934_v24, %v926_v23 }
 0x6a8   :  { %1530 = vtanh.f32 %v928_v28 }
 0x6a9   :  { %1532 = vtanh.f32 %v935_v26 }
 0x6b2   :  { %v1531_v29 = vpop.eup %1530 }
 0x6b3   :  { %v1533_v25 = vpop.eup %1532  ;;  %932 = vst.msk [vmem:[#allocation3 + $0x28] sm:$0xff] %vm266_vm1, %v1531_v29 }
 0x6b4   :  { %v938_v32 = vmul.f32 %v1533_v25, %v1903_v13 }
 0x6b6   :  { %v939_v33 = vadd.f32 %v938_v32, %v937_v31 }
 0x6b8   :  { %1298 = vmatmul.mubr.msk.f32.vlgmr.msra.gmra.mrb[10].mxu0 %vm266_vm1, %v939_v33  ;;  %v1021_v58 = vmul.f32 %v939_v33, %v1901_v12 }
 0x6b9   :  { %1478 = vmatpush3.bf16.msra.mxu0 %v1475_v20  ;;  %1387 = vmatprep.mubr.msk.f32.mxu0 %vm266_vm1, %v1100_v35 }
 0x6ba   :  { %1480 = vmatprep.subr.bf16.mxu0 %v1479_v34  ;;  %v1105_v40 = vld [vmem:[#allocation3 + $0x28] sm:$0xff] }
 0x6bd   :  { %1482 = vmatpush3.bf16.msra.mxu0 %v1479_v34 }
 0x6c0   :  { %1388 = vmatmul.mubr.msk.f32.vlgmr.msra.gmra.mrb[12].mxu0 %vm266_vm1, %v1101_v36 }
 0x6c1   :  { %1390 = vmatprep.mubr.msk.f32.mxu0 %vm266_vm1, %v1102_v37 }
 0x6c4   :  { %1391 = vmatmul.mubr.msk.f32.gmra.mrb[14].mxu0 %vm266_vm1, %v1103_v38 }
 0x6c5   :  { %1393 = vmatprep.mubr.msk.f32.mxu0 %vm266_vm1, %v1104_v39 }
 0x6c8   :  { %1394 = vmatmul.mubr.msk.f32.gmra.mrb[16].mxu0 %vm266_vm1, %v1105_v40 }
 0x78b   :  { %v1009_v41 = vpop.f32.mrb[10].mxu0 }
 0x78c   :  { %v1010_v42 = vadd.f32 %v1009_v41, %v1887_v60  ;;  %v1011_v43 = vpop.f32.mrb[11].mxu0 }
 0x78d   :  { %v1012_v45 = vadd.f32 %v1011_v43, %v1889_v61 }
 0x78e   :  { %v1019_v46 = vadd.f32 %v1018_v44, %v1010_v42 }
 0x78f   :  { %1534 = vtanh.f32 %v1012_v45 }
 0x790   :  { %1536 = vtanh.f32 %v1019_v46 }
 0x793   :  { %v1389_v48 = vpop.f32.mrb[12].mxu0 }
 0x794   :  { %v1215_v49 = vadd.f32 %v1389_v48, %v1300_v47  ;;  %v1209_v50 = vpop.f32.mrb[13].mxu0 }
 0x795   :  { %v1210_v51 = vadd.f32 %v1300_v47, %v1209_v50 }
 0x796   :  { %1249 = vst.msk [vmem:[#allocation13 + $0x8] sm:$0xff] %vm117_vm0, %v1215_v49 }
 0x797   :  { %1248 = vst.msk [vmem:[#allocation13] sm:$0xff] %vm117_vm0, %v1210_v51  ;;  %v1392_v60 = vpop.f32.mrb[14].mxu0 }
 0x798   :  { %v1225_v52 = vadd.f32 %v1392_v60, %v1300_v47  ;;  %v1219_v53 = vpop.f32.mrb[15].mxu0 }
 0x799   :  { %v1535_v54 = vpop.eup %1534  ;;  %v1220_v55 = vadd.f32 %v1300_v47, %v1219_v53 }
 0x79a   :  { %v1537_v56 = vpop.eup %1536  ;;  %1016 = vst.msk [vmem:[#allocation3 + $0x30] sm:$0xff] %vm266_vm1, %v1535_v54 }
 0x79b   :  { %1251 = vst.msk [vmem:[#allocation13 + $0x18] sm:$0xff] %vm117_vm0, %v1225_v52  ;;  %1250 = vst.msk [vmem:[#allocation13 + $0x10] sm:$0xff] %vm117_vm0, %v1220_v55  ;;  %v1395_v57 = vpop.f32.mrb[16].mxu0  ;;  %v1022_v59 = vmul.f32 %v1537_v56, %v1903_v13 }
 0x79c   :  { %v1235_v62 = vadd.f32 %v1395_v57, %v1300_v47  ;;  %v1229_v63 = vpop.f32.mrb[17].mxu0 }
 0x79d   :  { %v1230_v0 = vadd.f32 %v1300_v47, %v1229_v63  ;;  %v1023_v1 = vadd.f32 %v1022_v59, %v1021_v58 }
 0x79e   :  { %1253 = vst.msk [vmem:[#allocation13 + $0x28] sm:$0xff] %vm117_vm0, %v1235_v62 }
 0x79f   :  { %1252 = vst.msk [vmem:[#allocation13 + $0x20] sm:$0xff] %vm117_vm0, %v1230_v0  ;;  %1299 = vmatmul.mubr.msk.f32.vlgmr.msra.gmra.mrb[18].mxu1 %vm266_vm1, %v1023_v1 }
 0x7a1   :  { %v1106_v2 = vld [vmem:[#allocation3 + $0x30] sm:$0xff] }
 0x7a2   :  { %1396 = vmatprep.mubr.msk.f32.mxu0 %vm266_vm1, %v1106_v2 }
 0x872   :  { %v1093_v3 = vpop.f32.mrb[18].mxu1 }
 0x873   :  { %v1094_v4 = vpop.f32.mrb[19].mxu1 }
 0x874   :  { %v1095_v19 = vadd.f32 %v1094_v4, %v1889_v61 }
 0x876   :  { %1538 = vtanh.f32 %v1095_v19 }
 0x880   :  { %v1539_v12 = vpop.eup %1538 }
 0x881   :  { %1099 = vst.msk [vmem:[#allocation3 + $0x38] sm:$0xff] %vm266_vm1, %v1539_v12 }
 0x888   :  { %v1107_v13 = vld [vmem:[#allocation3 + $0x38] sm:$0xff] }
 0x889   :  { %1397 = vmatmul.mubr.msk.f32.gmra.mrb[18].mxu0 %vm266_vm1, %v1107_v13 }
 0x95c   :  { %v1398_v5 = vpop.f32.mrb[18].mxu0 }
 0x95d   :  { %v1245_v6 = vadd.f32 %v1398_v5, %v1300_v47  ;;  %v1239_v7 = vpop.f32.mrb[19].mxu0 }
 0x95e   :  { %v1240_v8 = vadd.f32 %v1300_v47, %v1239_v7 }
 0x95f   :  { %1255 = vst.msk [vmem:[#allocation13 + $0x38] sm:$0xff] %vm117_vm0, %v1245_v6 }
 0x960   :  { %1254 = vst.msk [vmem:[#allocation13 + $0x30] sm:$0xff] %vm117_vm0, %v1240_v8 }
 0x961   :  { %1661 = shalt.err (!%p1658_p2)
}
 0x962   :  { %s1662_s23 = scalar_lea.hbm %s2030_s10, 1024 }
 0x963   :  { %p1663_p3 = scmp.ne.s32.totalorder %s2030_s10, %s1662_s23  ;;  %p1666_p4 = scmp.lt.u32.totalorder %s1662_s23, %s2030_s10 }
 0x965   :  { %p1668_p5 = pnand %p1666_p4, %p1663_p3 }
 0x967   :  { %1671 = shalt.err (!%p1668_p5)
}
 0x968   :  { %1267 = dma.vmem_to_hbm [thread:$0]  %s1262_s1, 1024, %s2030_s10, [#allocation6], %s1682_s25, %s1682_s25, %s1683_s26  }
 0x969   :  { %1678 = dma.done.wait [#allocation6], 1024  }
 0x96a   :  { %1679 = vsyncadd [#allocation6], 4294966272 }
 0x96b   :  { %1271 = vsyncpa [#allocation5], 1 }
 0x96c   :  { %1272 = vsyncpa [#allocation8], 1 }
 0x96d   :  { %1273 = vsyncpa [#allocation11], 1 }
 0x96e   :  { %1274 = vsyncpa [#allocation6], 1 }

</bundles_post_ra>
